<compile_context>
chip_gen: v7x
topology: tpu7x:2x2x1
jax: 0.10.0
libtpu: 0.0.40
codegen_flags: <defaults>
</compile_context>

<pallas_src>
import jax
import jax.numpy as jnp
from jax.experimental import pallas as pl
from jax.experimental.pallas import tpu as pltpu

BN_EPS = 1e-5
_VMEM_LIMIT = 32 * 1024 * 1024  # explicit scoped-VMEM budget; safe on v5e/v6e/v7x


def _stats_kernel(xt_ref, sum_ref, sq_ref):
    """Pass 1: per-feature sum and sum-of-squares over the row axis.

    xt_ref : (k, tm) f32 tile -- features on sublanes, rows on lanes
    sum_ref: (k, 1)  f32 running per-feature sum        (resident accumulator)
    sq_ref : (k, 1)  f32 running per-feature sum of x^2 (resident accumulator)
    """
    @pl.when(pl.program_id(0) == 0)
    def _init():
        sum_ref[...] = jnp.zeros_like(sum_ref)
        sq_ref[...] = jnp.zeros_like(sq_ref)

    x = xt_ref[...]
    sum_ref[...] += jnp.sum(x, axis=1, keepdims=True)
    sq_ref[...] += jnp.sum(x * x, axis=1, keepdims=True)


def _apply_kernel(xt_ref, weff_ref, c_ref, o_ref):
    """Pass 2: out = sum_j x[j, :] * w_eff[j] + c   (BN + Linear folded).

    xt_ref  : (k, tm) f32 VMEM tile
    weff_ref: (k, 1)  f32 VMEM (loop-invariant block)
    c_ref   : (1,)    f32 SMEM scalar bias
    o_ref   : (1, tm) f32 VMEM (lane-dense output)
    """
    x = xt_ref[...]
    w = weff_ref[...]                                   # (k, 1) -> lane broadcast
    o_ref[...] = jnp.sum(x * w, axis=0, keepdims=True) + c_ref[0]


def enhanced_linear_regression(x, gamma, beta, w, b, *, tm=None):
    """x: (B, N, k) f32 -> (B, N) f32 (training-mode BatchNorm1d + Linear)."""
    B, N, k = x.shape
    M = B * N

    x = x.astype(jnp.float32)
    gamma = gamma.reshape(k).astype(jnp.float32)
    beta = beta.reshape(k).astype(jnp.float32)
    w_vec = w.reshape(k).astype(jnp.float32)
    b_sc = b.reshape(()).astype(jnp.float32)

    # Feature-major layout: k features on sublanes, the B*N rows on lanes.
    # One extra HBM pass for the transpose, but each (k, tm) tile is far
    # smaller in VMEM than the padded (tm, k) layout and the output is
    # naturally lane-dense.
    xt = x.reshape(M, k).T                              # (k, M)

    # Row (lane) tiling: 128-lane aligned tiles, generous but VMEM-bounded.
    if tm is None:
        tm = min(8192, 128 * pl.cdiv(M, 128))
    tm = max(128, (tm // 128) * 128)
    num_tiles = pl.cdiv(M, tm)
    M_pad = num_tiles * tm
    if M_pad != M:
        # Zero padding contributes 0 to sum / sum-of-squares; padded output
        # columns are sliced off below.
        xt = jnp.pad(xt, ((0, 0), (0, M_pad - M)))

    # ---------------- pass 1: streaming per-feature statistics ----------------
    ssum, ssq = pl.pallas_call(
        _stats_kernel,
        out_shape=(jax.ShapeDtypeStruct((k, 1), jnp.float32),
                   jax.ShapeDtypeStruct((k, 1), jnp.float32)),
        grid=(num_tiles,),
        in_specs=[pl.BlockSpec((k, tm), lambda i: (0, i))],
        out_specs=(pl.BlockSpec((k, 1), lambda i: (0, 0)),
                   pl.BlockSpec((k, 1), lambda i: (0, 0))),
        compiler_params=pltpu.CompilerParams(
            dimension_semantics=("arbitrary",),
            vmem_limit_bytes=_VMEM_LIMIT),
    )(xt)

    # ------- fold BatchNorm (training-mode, biased var) + Linear -> w_eff, c -------
    # var = E[x^2] - mean^2, accumulated in f32; for O(1)-scale inputs the
    # cancellation error is far below the 1e-4 tolerance.
    inv_m = jnp.float32(1.0 / M)
    mean = ssum[:, 0] * inv_m                           # (k,)
    var = ssq[:, 0] * inv_m - mean * mean               # (k,)
    g = jax.lax.rsqrt(var + BN_EPS) * gamma             # inv_std * gamma, (k,)
    w_eff = (g * w_vec).reshape(k, 1)                   # (k, 1)
    c = (b_sc + jnp.sum((beta - mean * g) * w_vec)).reshape(1)

    # ---------------- pass 2: streaming weighted row sum (VPU only) ----------------
    out_pad = pl.pallas_call(
        _apply_kernel,
        out_shape=jax.ShapeDtypeStruct((1, M_pad), jnp.float32),
        grid=(num_tiles,),
        in_specs=[
            pl.BlockSpec((k, tm), lambda i: (0, i)),
            pl.BlockSpec((k, 1), lambda i: (0, 0)),              # loop-invariant
            pl.BlockSpec(memory_space=pltpu.MemorySpace.SMEM),   # scalar bias
        ],
        out_specs=pl.BlockSpec((1, tm), lambda i: (0, i)),
        compiler_params=pltpu.CompilerParams(
            dimension_semantics=("parallel",),
            vmem_limit_bytes=_VMEM_LIMIT),
    )(xt, w_eff, c)

    return out_pad[0, :M].reshape(B, N)


if __name__ == "__main__":
    # Small shapes consistent with the module: batch_size=8, k=5 features.
    B, N, k = 8, 64, 5

    key = jax.random.PRNGKey(0)
    kx, kw, kg, kb = jax.random.split(key, 4)

    x = jax.random.normal(kx, (B, N, k), dtype=jnp.float32)

    # BatchNorm1d affine params (non-trivial values to exercise the fold).
    gamma = 1.0 + 0.1 * jax.random.normal(kg, (k,), dtype=jnp.float32)
    beta = 0.1 * jax.random.normal(kb, (k,), dtype=jnp.float32)

    # Linear(k, 1): xavier_normal_ weight, zero bias.
    xavier_std = (2.0 / (k + 1)) ** 0.5
    w = xavier_std * jax.random.normal(kw, (1, k), dtype=jnp.float32)
    b = jnp.zeros((1,), dtype=jnp.float32)

    # tm=128 so this small example exercises the multi-tile (grid=4) path.
    out = enhanced_linear_regression(x, gamma, beta, w, b, tm=128)
    out = jax.block_until_ready(out)

    # Pure-JAX reference (training-mode batch norm, biased variance).
    x2d = x.reshape(-1, k)
    mean = x2d.mean(axis=0, keepdims=True)
    var = ((x2d - mean) ** 2).mean(axis=0, keepdims=True)
    xn = (x2d - mean) / jnp.sqrt(var + BN_EPS) * gamma + beta
    ref = (xn @ w.T + b).reshape(B, N)

    assert jnp.allclose(out, ref, atol=1e-4, rtol=1e-4), "mismatch vs reference"
    print("KERNEL_OK")
</pallas_src>

<mosaic_0001>
module attributes {stable_mosaic.version = 11 : i64} {
  func.func @_stats_kernel(%arg0: i32, %arg1: memref<5x128xf32, #tpu.memory_space<vmem>>, %arg2: memref<5x1xf32, #tpu.memory_space<vmem>>, %arg3: memref<5x1xf32, #tpu.memory_space<vmem>>) attributes {dimension_semantics = [#tpu.dimension_semantics<arbitrary>], iteration_bounds = array<i64: 4>, scalar_prefetch = 0 : i64, scratch_operands = 0 : i64, tpu.core_type = #tpu.core_type<tc>, window_params = [{transform_indices = @transform_0, window_bounds = array<i64: 5, 128>}, {pipeline_mode = #tpu.pipeline_mode<synchronous>, transform_indices = @transform_1, window_bounds = array<i64: 5, 1>}, {pipeline_mode = #tpu.pipeline_mode<synchronous>, transform_indices = @transform_2, window_bounds = array<i64: 5, 1>}]} {
    %c0_i32 = arith.constant 0 : i32
    %0 = arith.cmpi eq, %arg0, %c0_i32 : i32
    %1 = arith.extui %0 : i1 to i32
    %c0_i32_0 = arith.constant 0 : i32
    %2 = arith.cmpi ne, %1, %c0_i32_0 : i32
    scf.if %2 {
      %cst_11 = arith.constant 0.000000e+00 : f32
      %15 = vector.broadcast %cst_11 : f32 to vector<5x1xf32>
      %c0_12 = arith.constant 0 : index
      %c0_13 = arith.constant 0 : index
      %16 = vector.load %arg2[%c0_12, %c0_13] : memref<5x1xf32, #tpu.memory_space<vmem>>, vector<5x1xf32>
      tpu.vector_store %arg2[%c0_12, %c0_13], %15 {strides = array<i32>} : memref<5x1xf32, #tpu.memory_space<vmem>>, vector<5x1xf32>,
      %cst_14 = arith.constant 0.000000e+00 : f32
      %17 = vector.broadcast %cst_14 : f32 to vector<5x1xf32>
      %c0_15 = arith.constant 0 : index
      %c0_16 = arith.constant 0 : index
      %18 = vector.load %arg3[%c0_15, %c0_16] : memref<5x1xf32, #tpu.memory_space<vmem>>, vector<5x1xf32>
      tpu.vector_store %arg3[%c0_15, %c0_16], %17 {strides = array<i32>} : memref<5x1xf32, #tpu.memory_space<vmem>>, vector<5x1xf32>,
    } else {
    }
    %c0 = arith.constant 0 : index
    %c0_1 = arith.constant 0 : index
    %3 = vector.load %arg1[%c0, %c0_1] : memref<5x128xf32, #tpu.memory_space<vmem>>, vector<5x128xf32>
    %c0_2 = arith.constant 0 : index
    %c0_3 = arith.constant 0 : index
    %4 = vector.load %arg2[%c0_2, %c0_3] : memref<5x1xf32, #tpu.memory_space<vmem>>, vector<5x1xf32>
    %cst = arith.constant dense<0.000000e+00> : vector<5xf32>
    %5 = vector.multi_reduction <add>, %3, %cst [1] : vector<5x128xf32> to vector<5xf32>
    %6 = vector.shape_cast %5 : vector<5xf32> to vector<5x1xf32>
    %7 = arith.addf %4, %6 : vector<5x1xf32>
    %c0_4 = arith.constant 0 : index
    %c0_5 = arith.constant 0 : index
    %8 = vector.load %arg2[%c0_4, %c0_5] : memref<5x1xf32, #tpu.memory_space<vmem>>, vector<5x1xf32>
    tpu.vector_store %arg2[%c0_4, %c0_5], %7 {strides = array<i32>} : memref<5x1xf32, #tpu.memory_space<vmem>>, vector<5x1xf32>,
    %c0_6 = arith.constant 0 : index
    %c0_7 = arith.constant 0 : index
    %9 = vector.load %arg3[%c0_6, %c0_7] : memref<5x1xf32, #tpu.memory_space<vmem>>, vector<5x1xf32>
    %10 = arith.mulf %3, %3 : vector<5x128xf32>
    %cst_8 = arith.constant dense<0.000000e+00> : vector<5xf32>
    %11 = vector.multi_reduction <add>, %10, %cst_8 [1] : vector<5x128xf32> to vector<5xf32>
    %12 = vector.shape_cast %11 : vector<5xf32> to vector<5x1xf32>
    %13 = arith.addf %9, %12 : vector<5x1xf32>
    %c0_9 = arith.constant 0 : index
    %c0_10 = arith.constant 0 : index
    %14 = vector.load %arg3[%c0_9, %c0_10] : memref<5x1xf32, #tpu.memory_space<vmem>>, vector<5x1xf32>
    tpu.vector_store %arg3[%c0_9, %c0_10], %13 {strides = array<i32>} : memref<5x1xf32, #tpu.memory_space<vmem>>, vector<5x1xf32>,
    return
  }
  func.func @transform_0(%arg0: i32) -> (i32, i32) {
    %c0_i32 = arith.constant 0 : i32
    %c0_i32_0 = arith.constant 0 : i32
    return %c0_i32, %arg0 : i32, i32
  }
  func.func @transform_1(%arg0: i32) -> (i32, i32) {
    %c0_i32 = arith.constant 0 : i32
    %c0_i32_0 = arith.constant 0 : i32
    %c0_i32_1 = arith.constant 0 : i32
    return %c0_i32, %c0_i32_0 : i32, i32
  }
  func.func @transform_2(%arg0: i32) -> (i32, i32) {
    %c0_i32 = arith.constant 0 : i32
    %c0_i32_0 = arith.constant 0 : i32
    %c0_i32_1 = arith.constant 0 : i32
    return %c0_i32, %c0_i32_0 : i32, i32
  }
}

</mosaic_0001>

<bundles_post_ra>
// kernel: tpu_custom_call.1
= control target key start
LH: loop header
LB: loop body
LE: loop exit
PB: predicated region body
PF: predicated region fallthrough
CT: control target
= control target key end

     0   :  { %8 = vsyncpa [#allocation3], 0  ;;  %s466_s0 = inlined_call_operand.hbm [shape: f32[5,512], index: 0, kind: input, shape index: {}]   ;;  %s467_s1 = inlined_call_operand.vmem [shape: f32[5,1], index: 1, kind: output, shape index: {0}]   ;;  %s468_s2 = inlined_call_operand.vmem [shape: f32[5,1], index: 2, kind: output, shape index: {1}]  }
   0x1   :  { %10 = vsyncpa [#allocation3 + $0x1], 0  ;;  %s345_s9 = smov 0   ;;  %s347_s10 = smov 0  }
   0x2   :  { %s349_s11 = smov 0   ;;  %s351_s12 = smov 0  }
   0x3 LB: > { %s212_s13 = sadd.s32 4294967295, %s326_s12   ;;  %s365_s14 = sadd.s32 1, %s326_s12   ;;  %s326_s12 = sphi %s351_s12, %s476_s12   ;;  %s322_s11 = sphi %s349_s11, %s475_s11   ;;  %s318_s10 = sphi %s347_s10, %s474_s10   ;;  %s314_s9 = sphi %s345_s9, %s473_s9  }
   0x4   : > { %s20_s15 = ssub.s32 %s326_s12, %s365_s14  ;;  %s23_s16 = sadd.s32 1, %s322_s11 }
   0x5   : > { %p21_p0 = scmp.eq.s32.totalorder %s20_s15, 0  ;;  %p30_p1 = scmp.ne.s32.totalorder %s322_s11, %s318_s10 }
   0x6   : > { %p31_p2 = scmp.eq.s32.totalorder %s326_s12, 0  ;;  %p36_p3 = scmp.ne.s32.totalorder %s318_s10, %s314_s9 }
   0x7   : > { %s375_s17 = scalar_select %p21_p0, %s322_s11, %s23_s16  }
   0x8   : > { %p32_p4 = por %p31_p2, %p30_p1  ;;  %p37_p5 = scmp.eq.s32.totalorder %s212_s13, 0 }
   0x9   : > { %p228_p6 = scmp.lt.s32.totalorder %s326_s12, 4  ;;  %s102_s19 = sand.u32 1, %s322_s11  }
   0xa   : > { %p380_p7 = por %p37_p5, %p36_p3  ;;  %s215_s20 = sshll.u32 %s102_s19, 3 }
   0xb   : > { %s216_s21 = sshll.u32 %s326_s12, 7  ;;  %s106_s25 = scalar_lea.vmem [#allocation2], %s215_s20 }
   0xc   : > { %s389_s24 = scalar_lea.hbm %s466_s0, %s216_s21  ;;  %s113_s26 = sshll.u32 %s106_s25, 4  ;;  %s391_s26 = int_to_ptr.vmem [resolvable:$true] %s113_s26 }
   0xd   : > { %p393_p8 = pnand %p228_p6, %p32_p4  ;;  %s103_s28 = scalar_lea.sflag [#allocation3], %s102_s19 }
   0xe   : > { %s262_s29 = scalar_lea.hbm %s389_s24, 128  ;;  %s267_s4 = scalar_lea.hbm %s466_s0, 512 }
   0xf   : > { %p263_p11 = scmp.ne.s32.totalorder %s389_s24, %s262_s29  ;;  %p264_p12 = pneg %p393_p8 }
  0x10   : > { %p268_p1 = scmp.lt.u32.totalorder %s389_s24, %s466_s0  ;;  %p269_p2 = scmp.lt.u32.totalorder %s267_s4, %s262_s29 }
  0x11   : > { %p265_p13 = pnand %p264_p12, %p263_p11  ;;  %p271_p4 = scmp.lt.u32.totalorder %s262_s29, %s389_s24 }
  0x12   : > { %p270_p3 = por %p269_p2, %p268_p1 }
  0x13   : > { %p266_p0 = pneg %p265_p13 }
  0x14   : > { %p272_p5 = por %p271_p4, %p270_p3 }
  0x16   : > { %p273_p6 = pnand %p272_p5, %p266_p0 }
  0x18   : > { %276 = shalt.err (!%p273_p6)
}
  0x19   : > { %s277_s7 = scalar_lea.vmem %s391_s26, 128  ;;  %s328_s8 = smov [#allocation2]  }
  0x1a   : > { %p278_p11 = scmp.ne.s32.totalorder %s391_s26, %s277_s7  ;;  %s282_s9 = sshll.u32 %s328_s8, 4  ;;  %s283_s9 = int_to_ptr.vmem [resolvable:$false] %s282_s9 }
  0x1b   : > { %s284_s15 = scalar_lea.vmem %s283_s9, 256  ;;  %p285_p10 = scmp.lt.s32.totalorder %s391_s26, %s283_s9 }
  0x1c   : > { %p280_p13 = pnand %p278_p11, %p264_p12  ;;  %p286_p1 = scmp.lt.s32.totalorder %s284_s15, %s277_s7 }
  0x1e   : > { %p281_p9 = pneg %p280_p13  ;;  %p287_p2 = por %p286_p1, %p285_p10 }
  0x20   : > { %p288_p3 = pnand %p287_p2, %p281_p9 }
  0x22   : > { %291 = shalt.err (!%p288_p3)
}
  0x23   : > { %227 = dma.hbm_to_vmem [thread:$0]  (!%p393_p8), %s389_s24, 128, %s391_s26, %s103_s28  }
  0x24   : > { %p471_p0 = scmp.lt.s32.totalorder %s326_s12, 5  ;;  %p472_p4 = scmp.ge.s32.totalorder %s326_s12, 1 }
  0x26   : > { %p119_p12 = pnand %p472_p4, %p471_p0 }
  0x27   : > { %s124_s16 = sand.u32 (!%p119_p12), 1, %s318_s10  }
  0x28   : > { %122 = sbr.rel (%p119_p12) target bundleno = 208 (0xd0), region = 24  ;;  %s218_s19 = sshll.u32 (!%p119_p12), %s124_s16, 3 }
  0x29   : > { %s125_s20 = scalar_lea.sflag (!%p119_p12), [#allocation3], %s124_s16  ;;  %s128_s21 = scalar_lea.vmem (!%p119_p12), [#allocation2], %s218_s19 }
  0x2f   : > { %309 = dma.done.wait (%p380_p7), %s125_s20, 128  }
  0x30   : > { %311 = vsyncadd (%p380_p7), %s125_s20, 4294967168  ;;  %p219_p9 = scmp.ne.s32.totalorder %s212_s13, 0 }
  0x31   : > { %vm148_vm0 = vcmask (!%p219_p9), 4096   ;;  %v329_v0 = vmov (!%p219_p9), 0.0  }
  0x32   : > { %147 = sbr.rel (%p219_p9) target bundleno = 57 (0x39), region = 32  ;;  %149 = vst.msk [vmem:[%s467_s1] sm:$0x1f] (!%p219_p9), %vm148_vm0, %v329_v0  ;;  %150 = vst.msk [vmem:[%s468_s2] sm:$0x1f] (!%p219_p9), %vm148_vm0, %v329_v0 }
  0x39 PF: > { %v151_v1 = vld [vmem:[%s128_s21] sm:$0x1f]  ;;  %vm153_vm1 = vcmask 1044480   ;;  %vm158_vm2 = vcmask 4096  }
  0x3a   : > { %v154_v2 = vsel %vm153_vm1, %v151_v1, 0.0  ;;  %v161_v3 = vmul.f32 %v151_v1, %v151_v1  ;;  %v152_v5 = vld [vmem:[%s467_s1] sm:$0x1f] }
  0x3b   : > { %155 = vadd.xlane.f32.xlu0 %v154_v2  ;;  %v160_v8 = vld [vmem:[%s468_s2] sm:$0x1f] }
  0x3c   : > { %v162_v4 = vsel %vm153_vm1, %v161_v3, 0.0 }
  0x3f   : > { %163 = vadd.xlane.f32.xlu0 %v162_v4 }
  0xc8   : > { %v156_v6 = vpop.xlane.xlu0 %155 }
  0xc9   : > { %v157_v7 = vadd.f32 %v156_v6, %v152_v5 }
  0xcb   : > { %159 = vst.msk [vmem:[%s467_s1] sm:$0x1f] %vm158_vm2, %v157_v7 }
  0xcc   : > { %v164_v9 = vpop.xlane.xlu0 %163 }
  0xcd   : > { %v165_v10 = vadd.f32 %v164_v9, %v160_v8 }
  0xcf   : > { %166 = vst.msk [vmem:[%s468_s2] sm:$0x1f] %vm158_vm2, %v165_v10 }
  0xd0 PF: > { %p13_p7 = scmp.ge.s32.totalorder %s365_s14, 6   ;;  %s473_s9 = smov %s318_s10 }
  0xd1   : > { %s474_s10 = smov %s322_s11  ;;  %s475_s11 = smov %s375_s17 }
  0xd2   : > { %s476_s12 = smov %s365_s14  ;;  %15 = sbr.rel (!%p13_p7) target bundleno = 3 (0x3), region = 72 }
  0xd9   :  { %184 = vsyncpa [#allocation3], 1 }
  0xda   :  { %186 = vsyncpa [#allocation3 + $0x1], 1 }

</bundles_post_ra>
